<compile_context>
chip_gen: v5e
topology: v5e:2x2
jax: 0.10.0
libtpu: 0.0.40
codegen_flags: <defaults>
</compile_context>

<pallas_src>
import functools
import math

import jax
import jax.numpy as jnp
from jax.experimental import pallas as pl
from jax.experimental.pallas import tpu as pltpu

LANES = 128
MAX_TILE_R = 8192    # 8192 x 128 x 4 B = 4 MiB per f32 input block
CHUNK_R = 64         # rows per streamed chunk (8 f32 vregs of d)


def _pick_chunk(tile_r):
    for c in (CHUNK_R, 32, 16, 8):
        if tile_r % c == 0:
            return c
    return tile_r


def _silog_kernel(x_ref, y_ref, s1_ref, s2_ref, *,
                  rows, tile_r, chunk_r, acc_rows, mask_rows, eps):
    i = pl.program_id(0)
    n_chunks = tile_r // chunk_r  # static

    def body(c, carry):
        s1, s2 = carry
        r0 = pl.multiple_of(c * chunk_r, chunk_r)
        x = x_ref[pl.ds(r0, chunk_r), :].astype(jnp.float32)
        y = y_ref[pl.ds(r0, chunk_r), :].astype(jnp.float32)
        # Exact reference semantics: d = log(x + eps) - log(y + eps).
        d = jnp.log(x + eps) - jnp.log(y + eps)
        if mask_rows:
            # Only compiled in when the tile grid over-covers the row count:
            # rows beyond `rows` in the last tile contain garbage (mask before
            # any reduction; select drops the unselected NaN/inf).
            local = jax.lax.broadcasted_iota(jnp.int32, d.shape, 0)
            valid = (i * tile_r + c * chunk_r + local) < rows
            d = jnp.where(valid, d, 0.0)
        if acc_rows == 8:
            # Pure-VPU accumulation into one (8,128) vreg per sum.
            d3 = d.reshape(chunk_r // 8, 8, LANES)
            s1 = s1 + jnp.sum(d3, axis=0)
            s2 = s2 + jnp.sum(d3 * d3, axis=0)
        else:
            # Tiny-input fallback (rows < 8): sublane reduce is fine here.
            s1 = s1 + jnp.sum(d, axis=0, keepdims=True)
            s2 = s2 + jnp.sum(d * d, axis=0, keepdims=True)
        return s1, s2

    zero = jnp.zeros((acc_rows, LANES), jnp.float32)
    unroll = True if n_chunks <= 4 else 2
    s1, s2 = jax.lax.fori_loop(0, n_chunks, body, (zero, zero), unroll=unroll)

    # Per-block lane-dense partial sums; cross-lane reduce deferred to wrapper.
    s1_ref[0] = s1
    s2_ref[0] = s2


def silog_loss(pred, target, variance_focus=0.85, eps=1e-8):
    """pred, target: (B, 1, H, W) positive depth maps. Returns scalar f32 loss."""
    assert pred.shape == target.shape
    n_valid = int(math.prod(pred.shape))
    assert n_valid > 1, "variance needs at least 2 elements"

    rows = -(-n_valid // LANES)
    padded = rows * LANES

    def to_slab(a):
        flat = a.reshape(-1)                      # contiguous reshape: free
        if padded != n_valid:
            # TODO(synk): ragged tail still takes a host-side pad (full HBM
            # round trip); replace with an in-kernel element mask over a 1-D
            # feed if non-multiple-of-128 depth maps ever matter.
            flat = jnp.pad(flat, (0, padded - n_valid), constant_values=1.0)
        return flat.reshape(rows, LANES)

    pred_s = to_slab(pred)
    tgt_s = to_slab(target)

    # --- tile selection -----------------------------------------------------
    if rows >= 1024:
        # At least 2 blocks so both v7x TensorCores get work; blocks are a
        # multiple of CHUNK_R (=> multiple of 8) and capped at MAX_TILE_R.
        target_blocks = max(2, -(-rows // MAX_TILE_R))
        tile_r = -(-rows // target_blocks)
        tile_r = -(-tile_r // CHUNK_R) * CHUNK_R
        tile_r = min(tile_r, MAX_TILE_R)
    elif rows >= 8:
        tile_r = ((rows + 7) // 8) * 8            # guarantee acc_rows==8 path
    else:
        tile_r = rows
    chunk_r = _pick_chunk(tile_r)
    acc_rows = 8 if chunk_r % 8 == 0 else 1
    n_blocks = -(-rows // tile_r)
    mask_rows = (n_blocks * tile_r != rows)

    kernel = functools.partial(
        _silog_kernel, rows=rows, tile_r=tile_r, chunk_r=chunk_r,
        acc_rows=acc_rows, mask_rows=mask_rows, eps=float(eps))

    in_bytes = (pred_s.size * pred_s.dtype.itemsize
                + tgt_s.size * tgt_s.dtype.itemsize)
    out_bytes = 2 * n_blocks * acc_rows * LANES * 4
    cost = pl.CostEstimate(flops=6 * n_valid,
                           transcendentals=2 * n_valid,   # two logs / element
                           bytes_accessed=in_bytes + out_bytes)

    part_shape = jax.ShapeDtypeStruct((n_blocks, acc_rows, LANES), jnp.float32)
    s1_part, s2_part = pl.pallas_call(
        kernel,
        out_shape=(part_shape, part_shape),
        grid_spec=pltpu.PrefetchScalarGridSpec(
            num_scalar_prefetch=0,
            grid=(n_blocks,),
            in_specs=[
                pl.BlockSpec((tile_r, LANES), lambda i: (i, 0)),
                pl.BlockSpec((tile_r, LANES), lambda i: (i, 0)),
            ],
            out_specs=(
                pl.BlockSpec((1, acc_rows, LANES), lambda i: (i, 0, 0)),
                pl.BlockSpec((1, acc_rows, LANES), lambda i: (i, 0, 0)),
            ),
        ),
        compiler_params=pltpu.CompilerParams(
            dimension_semantics=("parallel",),
            vmem_limit_bytes=32 * 1024 * 1024),
        cost_estimate=cost,
    )(pred_s, tgt_s)

    # Tiny scalar combine in plain JAX (keeps the grid axis fully parallel).
    s1 = jnp.sum(s1_part, dtype=jnp.float32)      # sum(d)
    s2 = jnp.sum(s2_part, dtype=jnp.float32)      # sum(d^2)
    n = jnp.float32(n_valid)
    mse = s2 / n                                  # torch.mean(d ** 2)
    var = (s2 - s1 * s1 / n) / (n - 1.0)          # torch.var default: unbiased
    vf = jnp.float32(variance_focus)
    return vf * var + (1.0 - vf) * mse


if __name__ == "__main__":
    key = jax.random.PRNGKey(0)
    k1, k2 = jax.random.split(key)
    B, C, H, W = 2, 1, 16, 16
    # depth maps must be positive (log)
    pred = jax.random.uniform(k1, (B, C, H, W), jnp.float32, minval=0.1, maxval=10.0)
    target = jax.random.uniform(k2, (B, C, H, W), jnp.float32, minval=0.1, maxval=10.0)

    loss = silog_loss(pred, target)
    jax.block_until_ready(loss)

    # reference check in plain JAX (same semantics as the PyTorch module)
    eps = 1e-8
    d = jnp.log(pred + eps) - jnp.log(target + eps)
    n = d.size
    mse = jnp.mean(d ** 2)
    var = jnp.sum((d - jnp.mean(d)) ** 2) / (n - 1)   # torch.var default: unbiased
    ref = 0.85 * var + 0.15 * mse
    assert jnp.allclose(loss, ref, rtol=1e-4, atol=1e-6), (loss, ref)

    print("KERNEL_OK")
</pallas_src>

<mosaic_0001>
module attributes {stable_mosaic.version = 11 : i64} {
  func.func @_silog_kernel(%arg0: i32, %arg1: memref<4x128xf32, #tpu.memory_space<vmem>>, %arg2: memref<4x128xf32, #tpu.memory_space<vmem>>, %arg3: memref<1x1x128xf32, #tpu.memory_space<vmem>>, %arg4: memref<1x1x128xf32, #tpu.memory_space<vmem>>) attributes {dimension_semantics = [#tpu.dimension_semantics<parallel>], iteration_bounds = array<i64: 1>, scalar_prefetch = 0 : i64, scratch_operands = 0 : i64, tpu.core_type = #tpu.core_type<tc>, window_params = [{transform_indices = @transform_0, window_bounds = array<i64: 4, 128>}, {transform_indices = @transform_1, window_bounds = array<i64: 4, 128>}, {transform_indices = @transform_2, window_bounds = array<i64: 1, 1, 128>}, {transform_indices = @transform_3, window_bounds = array<i64: 1, 1, 128>}]} {
    %cst = arith.constant 0.000000e+00 : f32
    %0 = vector.broadcast %cst : f32 to vector<1x128xf32>
    %c0_i32 = arith.constant 0 : i32
    %c4_i32 = arith.constant 4 : i32
    %1 = arith.muli %c0_i32, %c4_i32 : i32
    %2 = tpu.assume_multiple %1, 4 : i32
    %3 = arith.index_cast %2 : i32 to index
    %c0 = arith.constant 0 : index
    %4 = vector.load %arg1[%3, %c0] : memref<4x128xf32, #tpu.memory_space<vmem>>, vector<4x128xf32>
    %5 = arith.index_cast %2 : i32 to index
    %c0_0 = arith.constant 0 : index
    %6 = vector.load %arg2[%5, %c0_0] : memref<4x128xf32, #tpu.memory_space<vmem>>, vector<4x128xf32>
    %cst_1 = arith.constant 9.99999993E-9 : f32
    %7 = vector.broadcast %cst_1 : f32 to vector<4x128xf32>
    %8 = arith.addf %4, %7 : vector<4x128xf32>
    %9 = math.log %8 : vector<4x128xf32>
    %cst_2 = arith.constant 9.99999993E-9 : f32
    %10 = vector.broadcast %cst_2 : f32 to vector<4x128xf32>
    %11 = arith.addf %6, %10 : vector<4x128xf32>
    %12 = math.log %11 : vector<4x128xf32>
    %13 = arith.subf %9, %12 : vector<4x128xf32>
    %cst_3 = arith.constant dense<0.000000e+00> : vector<128xf32>
    %14 = vector.multi_reduction <add>, %13, %cst_3 [0] : vector<4x128xf32> to vector<128xf32>
    %15 = vector.shape_cast %14 : vector<128xf32> to vector<1x128xf32>
    %16 = arith.addf %0, %15 : vector<1x128xf32>
    %17 = arith.mulf %13, %13 : vector<4x128xf32>
    %cst_4 = arith.constant dense<0.000000e+00> : vector<128xf32>
    %18 = vector.multi_reduction <add>, %17, %cst_4 [0] : vector<4x128xf32> to vector<128xf32>
    %19 = vector.shape_cast %18 : vector<128xf32> to vector<1x128xf32>
    %20 = arith.addf %0, %19 : vector<1x128xf32>
    %c1_i32 = arith.constant 1 : i32
    %c0_5 = arith.constant 0 : index
    %c0_6 = arith.constant 0 : index
    %c0_7 = arith.constant 0 : index
    %21 = vector.load %arg3[%c0_5, %c0_6, %c0_7] : memref<1x1x128xf32, #tpu.memory_space<vmem>>, vector<1x1x128xf32>
    %22 = vector.shape_cast %21 : vector<1x1x128xf32> to vector<1x128xf32>
    %23 = vector.shape_cast %16 : vector<1x128xf32> to vector<1x1x128xf32>
    tpu.vector_store %arg3[%c0_5, %c0_6, %c0_7], %23 {strides = array<i32>} : memref<1x1x128xf32, #tpu.memory_space<vmem>>, vector<1x1x128xf32>,
    %c0_8 = arith.constant 0 : index
    %c0_9 = arith.constant 0 : index
    %c0_10 = arith.constant 0 : index
    %24 = vector.load %arg4[%c0_8, %c0_9, %c0_10] : memref<1x1x128xf32, #tpu.memory_space<vmem>>, vector<1x1x128xf32>
    %25 = vector.shape_cast %24 : vector<1x1x128xf32> to vector<1x128xf32>
    %26 = vector.shape_cast %20 : vector<1x128xf32> to vector<1x1x128xf32>
    tpu.vector_store %arg4[%c0_8, %c0_9, %c0_10], %26 {strides = array<i32>} : memref<1x1x128xf32, #tpu.memory_space<vmem>>, vector<1x1x128xf32>,
    return
  }
  func.func @transform_0(%arg0: i32) -> (i32, i32) {
    %c0_i32 = arith.constant 0 : i32
    %c0_i32_0 = arith.constant 0 : i32
    return %arg0, %c0_i32 : i32, i32
  }
  func.func @transform_1(%arg0: i32) -> (i32, i32) {
    %c0_i32 = arith.constant 0 : i32
    %c0_i32_0 = arith.constant 0 : i32
    return %arg0, %c0_i32 : i32, i32
  }
  func.func @transform_2(%arg0: i32) -> (i32, i32, i32) {
    %c0_i32 = arith.constant 0 : i32
    %c0_i32_0 = arith.constant 0 : i32
    %c0_i32_1 = arith.constant 0 : i32
    return %arg0, %c0_i32, %c0_i32_0 : i32, i32, i32
  }
  func.func @transform_3(%arg0: i32) -> (i32, i32, i32) {
    %c0_i32 = arith.constant 0 : i32
    %c0_i32_0 = arith.constant 0 : i32
    %c0_i32_1 = arith.constant 0 : i32
    return %arg0, %c0_i32, %c0_i32_0 : i32, i32, i32
  }
}

</mosaic_0001>

<bundles_post_ra>
// kernel: tpu_custom_call.1
= control target key start
LH: loop header
LB: loop body
LE: loop exit
PB: predicated region body
PF: predicated region fallthrough
CT: control target
= control target key end

     0   :  { %9 = vsyncpa [#allocation3], 0  ;;  %s254_s0 = inlined_call_operand.hbm [shape: f32[4,128], index: 0, kind: input, shape index: {}]   ;;  %s255_s1 = inlined_call_operand.hbm [shape: f32[4,128], index: 1, kind: input, shape index: {}]   ;;  %s256_s2 = inlined_call_operand.hbm [shape: f32[1,1,128], index: 2, kind: output, shape index: {0}]   ;;  %s257_s3 = inlined_call_operand.hbm [shape: f32[1,1,128], index: 3, kind: output, shape index: {1}]  }
   0x1   :  { %10 = vsyncpa [#allocation6], 0 }
   0x2   :  { %11 = vsyncpa [#allocation4], 0 }
   0x3   :  { %12 = vsyncpa [#allocation9], 0  ;;  %s18_s14 = sshll.u32 %s254_s0, 4  ;;  %s218_s15 = smov [#allocation2]   ;;  %s19_s14 = int_to_ptr.hbm [resolvable:$true] %s18_s14 }
   0x4   :  { %s20_s16 = sshll.u32 %s218_s15, 4  ;;  %s29_s19 = sshll.u32 %s255_s1, 4  ;;  %s21_s16 = int_to_ptr.vmem [resolvable:$true] %s20_s16  ;;  %s30_s19 = int_to_ptr.hbm [resolvable:$true] %s29_s19 }
   0x5   :  { %23 = dma.hbm_to_vmem [thread:$0]  %s19_s14, 64, %s21_s16, [#allocation3]  }
   0x6   :  { %s219_s20 = smov [#allocation5]  }
   0x7   :  { %s31_s21 = sshll.u32 %s219_s20, 4  ;;  %s32_s21 = int_to_ptr.vmem [resolvable:$true] %s31_s21 }
   0x8   :  { %34 = dma.hbm_to_vmem [thread:$0]  %s30_s19, 64, %s32_s21, [#allocation6]  }
   0x9   :  { %210 = dma.done.wait [#allocation3], 64  }
   0xa   :  { %211 = vsyncadd [#allocation3], 4294967232 }
   0xb   :  { %212 = dma.done.wait [#allocation6], 64  }
   0xc   :  { %213 = vsyncadd [#allocation6], 4294967232  ;;  %v43_v0 = vld [vmem:[#allocation2] sm:$0xf]  ;;  %v44_v1 = vld [vmem:[#allocation5] sm:$0xf] }
   0xd   :  { %v45_v2 = vadd.f32 1e-08, %v43_v0  ;;  %v48_v3 = vadd.f32 1e-08, %v44_v1  ;;  %vm52_vm0 = vcmask 1043456   ;;  %s220_s0 = smov [#allocation7]  }
   0xe   :  { %s77_s1 = sshll.u32 %s220_s0, 4  ;;  %s79_s24 = sshll.u32 %s256_s2, 4  ;;  %s78_s1 = int_to_ptr.vmem [resolvable:$true] %s77_s1  ;;  %s80_s24 = int_to_ptr.hbm [resolvable:$true] %s79_s24 }
   0xf   :  { %110 = vlog2.f32 %v45_v2  ;;  %s221_s25 = smov [#allocation8]   ;;  %s90_s29 = sshll.u32 %s257_s3, 4  ;;  %s91_s29 = int_to_ptr.hbm [resolvable:$true] %s90_s29 }
  0x10   :  { %112 = vlog2.f32 %v48_v3  ;;  %s88_s26 = sshll.u32 %s221_s25, 4  ;;  %s89_s26 = int_to_ptr.vmem [resolvable:$true] %s88_s26 }
  0x15   :  { %v111_v4 = vpop.eup %110 }
  0x16   :  { %v113_v5 = vpop.eup %112  ;;  %v47_v6 = vmul.f32 0.6931472, %v111_v4 }
  0x17   :  { %v50_v7 = vmul.f32 0.6931472, %v113_v5 }
  0x19   :  { %v51_v8 = vsub.f32 %v47_v6, %v50_v7 }
  0x1b   :  { %v53_v9 = vsel %vm52_vm0, %v51_v8, 0.0  ;;  %v61_v10 = vmul.f32 %v51_v8, %v51_v8 }
  0x1c   :  { %v54_v11 = vrot.slane %v53_v9, 4 }
  0x1d   :  { %v62_v12 = vsel %vm52_vm0, %v61_v10, 0.0 }
  0x1e   :  { %v55_v13 = vadd.f32 %v54_v11, %v53_v9  ;;  %v63_v14 = vrot.slane %v62_v12, 4 }
  0x20   :  { %v56_v15 = vrot.slane %v55_v13, 2  ;;  %v64_v16 = vadd.f32 %v63_v14, %v62_v12 }
  0x22   :  { %v57_v17 = vadd.f32 %v56_v15, %v55_v13  ;;  %v65_v18 = vrot.slane %v64_v16, 2 }
  0x24   :  { %v58_v19 = vrot.slane %v57_v17, 1  ;;  %v66_v20 = vadd.f32 %v65_v18, %v64_v16 }
  0x26   :  { %v59_v21 = vadd.f32 %v58_v19, %v57_v17  ;;  %v67_v22 = vrot.slane %v66_v20, 1 }
  0x28   :  { %70 = vst [vmem:[#allocation7] sm:$0x1] %v59_v21  ;;  %v68_v23 = vadd.f32 %v67_v22, %v66_v20 }
  0x29   :  { %82 = dma.vmem_to_hbm [thread:$0]  %s78_s1, 16, %s80_s24, [#allocation4]  }
  0x2a   :  { %71 = vst [vmem:[#allocation8] sm:$0x1] %v68_v23 }
  0x2b   :  { %93 = dma.vmem_to_hbm [thread:$0]  %s89_s26, 16, %s91_s29, [#allocation9]  }
  0x2c   :  { %214 = dma.done.wait [#allocation4], 16  }
  0x2d   :  { %215 = vsyncadd [#allocation4], 4294967280 }
  0x2e   :  { %216 = dma.done.wait [#allocation9], 16  }
  0x2f   :  { %217 = vsyncadd [#allocation9], 4294967280 }
  0x30   :  { %102 = vsyncpa [#allocation3], 1 }
  0x31   :  { %103 = vsyncpa [#allocation6], 1 }
  0x32   :  { %104 = vsyncpa [#allocation4], 1 }
  0x33   :  { %105 = vsyncpa [#allocation9], 1 }

</bundles_post_ra>
